<compile_context>
chip_gen: v7x
topology: tpu7x:2x2x1
jax: 0.10.0
libtpu: 0.0.40
codegen_flags: <defaults>
</compile_context>

<pallas_src>
import functools

import jax
import jax.numpy as jnp
from jax import lax
from jax.experimental import pallas as pl
from jax.experimental.pallas import tpu as pltpu


# ------------------------------ planning helpers --------------------------------

def _round_up(x, m):
    return ((x + m - 1) // m) * m


def _tpu_vmem_capacity_bytes():
    # Chip-aware budget; fall back to the most conservative value (v7x per-TC)
    # if the query is unavailable (e.g. interpret mode).
    try:
        return int(pltpu.get_tpu_info().vmem_capacity_bytes)
    except Exception:
        return 64 << 20


def _plan(S, B, H, itemsize):
    """Pick the S tile, padded S, flat rows per step, and Mosaic params.

    The streamed enc block is (tile_s * B, H) flat rows.  tile_s is a multiple of
    8 (so the flat-row / sublane axis stays aligned) and is sized from the chip's
    VMEM capacity; the BlockSpec pipeline double-buffers the block.
    """
    cap = _tpu_vmem_capacity_bytes()
    blk_budget = max(512 << 10, cap // 16)                 # per-buffer enc-stream budget
    tile_s = max(8, (blk_budget // max(1, B * H * itemsize)) // 8 * 8)
    tile_s = min(tile_s, _round_up(S, 8))                  # never pad tiny S up to a huge tile
    s_pad = _round_up(S, tile_s)
    n_steps = s_pad // tile_s
    rows = tile_s * B                                      # flat rows per grid step

    # VMEM high-water mark: double-buffered enc block + resident broadcast
    # pattern(s) + resident energy buffer + weights + slack.
    need = 6 * rows * H * itemsize + 4 * s_pad * B * 4 + (4 << 20)
    vmem_limit = max(32 << 20, min(need, (cap * 3) // 4))
    params = pltpu.CompilerParams(
        dimension_semantics=("arbitrary",),                # resident output => sequential S axis
        vmem_limit_bytes=int(vmem_limit),
    )
    return tile_s, s_pad, n_steps, rows, params


# ----------------------------------- kernels -------------------------------------

def _softmax_over_seq(out_ref, batch, n_valid):
    """Finalize: softmax over the sequence axis (torch dim=0), in place on the
    VMEM-resident energy buffer.

    out_ref has shape (n_steps, rows); flat position p = step*rows + j equals the
    flattened (s, b) index p = s*batch + b, so the batch id of lane j is simply
    j % batch (rows is a multiple of batch).  All reductions are lane-direction
    masked reductions; normalization uses an exact division (columns sum to 1).
    """
    e = out_ref[...]                                                   # (n_steps, rows) f32
    row_id = lax.broadcasted_iota(jnp.int32, e.shape, 0)
    col_id = lax.broadcasted_iota(jnp.int32, e.shape, 1)
    pos = row_id * e.shape[1] + col_id                                 # == s*batch + b
    valid = pos < n_valid                                              # mask the padded tail
    if (batch & (batch - 1)) == 0:                                     # static python branch
        bidx = jnp.bitwise_and(col_id, batch - 1)
    else:
        bidx = col_id % batch

    m_sel = jnp.zeros_like(e)
    l_sel = jnp.ones_like(e)
    for b in range(batch):                       # batch is small & static -> unrolled
        sel = jnp.logical_and(bidx == b, valid)
        m_b = jnp.max(jnp.where(sel, e, -jnp.inf))                     # max over s (column b)
        ex_b = jnp.exp(jnp.where(sel, e, m_b) - m_b)                   # overflow-safe
        l_b = jnp.sum(jnp.where(sel, ex_b, 0.0))                       # sum over s (column b)
        on_b = bidx == b
        m_sel = jnp.where(on_b, m_b, m_sel)
        l_sel = jnp.where(on_b, l_b, l_sel)

    p = jnp.exp(jnp.where(valid, e, m_sel) - m_sel) / l_sel            # exact normalization
    out_ref[...] = jnp.where(valid, p, 0.0)


def _store_energies(out_ref, e, batch, n_valid):
    step = pl.program_id(0)
    out_ref[step, :] = e                          # dense, statically-shaped row store

    @pl.when(step == pl.num_programs(0) - 1)
    def _():
        _softmax_over_seq(out_ref, batch, n_valid)


def _dot_energy_kernel(enc_ref, qpat_ref, out_ref, *, batch, n_valid):
    # e[r] = enc_flat[r, :] . q[r % batch, :]    (q pattern pre-tiled, VMEM resident)
    enc = enc_ref[...].astype(jnp.float32)                             # (rows, H)
    e = jnp.sum(enc * qpat_ref[...], axis=1)                           # (rows,)  lane reduce
    _store_energies(out_ref, e, batch, n_valid)


def _concat_energy_kernel(enc_ref, we_t_ref, dproj_ref, v_ref, out_ref, *, batch, n_valid):
    # energy = tanh(enc @ We^T + (dec @ Wd^T + bias));  e = energy . v
    enc = enc_ref[...].astype(jnp.float32)                             # (rows, H)
    proj = jnp.dot(enc, we_t_ref[...], preferred_element_type=jnp.float32)   # MXU
    energy = jnp.tanh(proj + dproj_ref[...])                           # EUP
    e = jnp.sum(energy * v_ref[...], axis=1)                           # (rows,)
    _store_energies(out_ref, e, batch, n_valid)


# ---------------------------------- wrappers --------------------------------------

def _prep_enc(enc_outs, s_pad):
    S, B, H = enc_outs.shape
    enc_flat = enc_outs.reshape(S * B, H)          # free, contiguous reshape
    if s_pad != S:
        enc_flat = jnp.pad(enc_flat, ((0, (s_pad - S) * B), (0, 0)))
    return enc_flat


def _launch_elementwise_energy(enc_outs, q):
    """Shared launcher for 'dot' (q = dec) and 'general' (q = dec @ W)."""
    S, B, H = enc_outs.shape
    tile_s, s_pad, n_steps, rows, params = _plan(S, B, H, jnp.dtype(enc_outs.dtype).itemsize)
    enc_flat = _prep_enc(enc_outs, s_pad)
    q_pattern = jnp.tile(q.astype(jnp.float32), (tile_s, 1))           # (rows, H), loaded once

    kernel = functools.partial(_dot_energy_kernel, batch=B, n_valid=S * B)
    out = pl.pallas_call(
        kernel,
        out_shape=jax.ShapeDtypeStruct((n_steps, rows), jnp.float32),
        grid_spec=pltpu.PrefetchScalarGridSpec(
            num_scalar_prefetch=0,
            grid=(n_steps,),
            in_specs=[
                pl.BlockSpec((rows, H), lambda i: (i, 0)),             # streamed enc tiles
                pl.BlockSpec((rows, H), lambda i: (0, 0)),             # resident q pattern
            ],
            out_specs=pl.BlockSpec((n_steps, rows), lambda i: (0, 0)),  # resident energies
        ),
        compiler_params=params,
    )(enc_flat, q_pattern)
    return out.reshape(s_pad, B)[:S]                                   # (S, B), free reshape


@jax.jit
def attention_dot(dec_out, enc_outs):
    _, B, H = dec_out.shape
    return _launch_elementwise_energy(enc_outs, dec_out.reshape(B, H))


@jax.jit
def attention_general(dec_out, enc_outs, w, b):
    _, B, H = dec_out.shape
    dec = dec_out.reshape(B, H).astype(jnp.float32)
    # general:  sum_h dec_h * (enc @ W^T + bias)_h  ==  enc . (dec @ W) + dec . bias.
    # The 'dec . bias' term is constant along the sequence axis, so it cancels in the
    # dim-0 softmax; it is dropped (mathematically exact for the module's output).
    q = jnp.dot(dec, w.astype(jnp.float32), precision=lax.Precision.HIGHEST)
    del b
    return _launch_elementwise_energy(enc_outs, q)


@jax.jit
def attention_concat(dec_out, enc_outs, w, b, v):
    S, B, H = enc_outs.shape
    tile_s, s_pad, n_steps, rows, params = _plan(S, B, H, jnp.dtype(enc_outs.dtype).itemsize)
    enc_flat = _prep_enc(enc_outs, s_pad)

    dec = dec_out.reshape(B, H).astype(jnp.float32)
    w32 = w.astype(jnp.float32)
    wd_t = w32[:, :H].T                     # (H, H): half applied to the dec part of the concat
    we_t = w32[:, H:].T                     # (H, H): half applied to the enc part
    # Sequence-invariant dec projection + bias hoisted out of the S loop; tiled to the
    # per-step row pattern once and kept VMEM-resident via a constant-index BlockSpec.
    dproj = jnp.dot(dec, wd_t, precision=lax.Precision.HIGHEST) + b.astype(jnp.float32)
    dproj_pattern = jnp.tile(dproj, (tile_s, 1))                       # (rows, H)

    kernel = functools.partial(_concat_energy_kernel, batch=B, n_valid=S * B)
    out = pl.pallas_call(
        kernel,
        out_shape=jax.ShapeDtypeStruct((n_steps, rows), jnp.float32),
        grid_spec=pltpu.PrefetchScalarGridSpec(
            num_scalar_prefetch=0,
            grid=(n_steps,),
            in_specs=[
                pl.BlockSpec((rows, H), lambda i: (i, 0)),             # streamed enc tiles
                pl.BlockSpec((H, H), lambda i: (0, 0)),                # We^T (resident)
                pl.BlockSpec((rows, H), lambda i: (0, 0)),             # dec-projection pattern
                pl.BlockSpec((1, H), lambda i: (0, 0)),                # v
            ],
            out_specs=pl.BlockSpec((n_steps, rows), lambda i: (0, 0)),
        ),
        compiler_params=params,
    )(enc_flat, we_t, dproj_pattern, v.reshape(1, H).astype(jnp.float32))
    return out.reshape(s_pad, B)[:S]


# ----------------------------- pure-JAX references --------------------------------

def _ref_softmax0(e):
    return jax.nn.softmax(e, axis=0)


def _ref_dot(dec_out, enc_outs):
    return _ref_softmax0(jnp.sum(dec_out * enc_outs, axis=2))


def _ref_general(dec_out, enc_outs, w, b):
    energy = jnp.einsum('sbh,oh->sbo', enc_outs, w,
                        precision=lax.Precision.HIGHEST) + b
    return _ref_softmax0(jnp.sum(dec_out * energy, axis=2))


def _ref_concat(dec_out, enc_outs, w, b, v):
    dec = jnp.broadcast_to(dec_out, enc_outs.shape)
    cat = jnp.concatenate([dec, enc_outs], axis=2)
    energy = jnp.tanh(jnp.einsum('sbk,ok->sbo', cat, w,
                                 precision=lax.Precision.HIGHEST) + b)
    return _ref_softmax0(jnp.sum(v * energy, axis=2))


# ------------------------------------- main ----------------------------------------

if __name__ == "__main__":
    S, B, H = 8, 2, 32   # seq=8, batch=2, hidden=32

    key = jax.random.PRNGKey(0)
    k1, k2, k3, k4, k5, k6, k7 = jax.random.split(key, 7)

    dec_out = jax.random.normal(k1, (1, B, H), dtype=jnp.float32)
    enc_outs = jax.random.normal(k2, (S, B, H), dtype=jnp.float32)

    # 'general' params: nn.Linear(H, H)  (weight is (out, in))
    w_gen = jax.random.normal(k3, (H, H), dtype=jnp.float32) * 0.1
    b_gen = jax.random.normal(k4, (H,), dtype=jnp.float32) * 0.1

    # 'concat' params: nn.Linear(2H, H) and v of shape (H,)
    w_cat = jax.random.normal(k5, (H, 2 * H), dtype=jnp.float32) * 0.1
    b_cat = jax.random.normal(k6, (H,), dtype=jnp.float32) * 0.1
    v_cat = jax.random.normal(k7, (H,), dtype=jnp.float32) * 0.1

    out_dot = jax.block_until_ready(attention_dot(dec_out, enc_outs))
    out_gen = jax.block_until_ready(attention_general(dec_out, enc_outs, w_gen, b_gen))
    out_cat = jax.block_until_ready(attention_concat(dec_out, enc_outs, w_cat, b_cat, v_cat))

    ref_dot = _ref_dot(dec_out, enc_outs)
    ref_gen = _ref_general(dec_out, enc_outs, w_gen, b_gen)
    ref_cat = _ref_concat(dec_out, enc_outs, w_cat, b_cat, v_cat)

    assert out_dot.shape == (S, B) and out_gen.shape == (S, B) and out_cat.shape == (S, B)
    assert jnp.allclose(out_dot, ref_dot, atol=1e-4, rtol=1e-4)
    assert jnp.allclose(out_gen, ref_gen, atol=1e-4, rtol=1e-4)
    # 'concat' runs an in-kernel f32 matmul on the MXU (default matmul precision), so it
    # gets a slightly looser tolerance than the purely-VPU 'dot'/'general' paths.
    assert jnp.allclose(out_cat, ref_cat, atol=5e-3, rtol=5e-3)
    # Exact (non-approximate) normalization: every column of the dim-0 softmax sums to 1.
    ones = jnp.ones((B,), jnp.float32)
    assert jnp.allclose(jnp.sum(out_dot, axis=0), ones, atol=1e-4)
    assert jnp.allclose(jnp.sum(out_gen, axis=0), ones, atol=1e-4)
    assert jnp.allclose(jnp.sum(out_cat, axis=0), ones, atol=1e-4)

    print("KERNEL_OK")
</pallas_src>

<mosaic_0001>
module attributes {stable_mosaic.version = 11 : i64} {
  func.func @_dot_energy_kernel(%arg0: i32, %arg1: memref<16x32xf32, #tpu.memory_space<vmem>>, %arg2: memref<16x32xf32, #tpu.memory_space<vmem>>, %arg3: memref<1x16xf32, #tpu.memory_space<vmem>>) attributes {dimension_semantics = [#tpu.dimension_semantics<arbitrary>], iteration_bounds = array<i64: 1>, scalar_prefetch = 0 : i64, scratch_operands = 0 : i64, tpu.core_type = #tpu.core_type<tc>, window_params = [{transform_indices = @transform_0, window_bounds = array<i64: 16, 32>}, {pipeline_mode = #tpu.pipeline_mode<synchronous>, transform_indices = @transform_1, window_bounds = array<i64: 16, 32>}, {pipeline_mode = #tpu.pipeline_mode<synchronous>, transform_indices = @transform_2, window_bounds = array<i64: 1, 16>}]} {
    %c0 = arith.constant 0 : index
    %c0_0 = arith.constant 0 : index
    %0 = vector.load %arg1[%c0, %c0_0] : memref<16x32xf32, #tpu.memory_space<vmem>>, vector<16x32xf32>
    %c0_1 = arith.constant 0 : index
    %c0_2 = arith.constant 0 : index
    %1 = vector.load %arg2[%c0_1, %c0_2] : memref<16x32xf32, #tpu.memory_space<vmem>>, vector<16x32xf32>
    %2 = arith.mulf %0, %1 : vector<16x32xf32>
    %cst = arith.constant dense<0.000000e+00> : vector<16xf32>
    %3 = vector.multi_reduction <add>, %2, %cst [1] : vector<16x32xf32> to vector<16xf32>
    %4 = arith.index_cast %arg0 : i32 to index
    %c0_3 = arith.constant 0 : index
    %5 = vector.load %arg3[%4, %c0_3] : memref<1x16xf32, #tpu.memory_space<vmem>>, vector<1x16xf32>
    %6 = vector.shape_cast %5 : vector<1x16xf32> to vector<16xf32>
    %7 = vector.shape_cast %3 : vector<16xf32> to vector<1x16xf32>
    tpu.vector_store %arg3[%4, %c0_3], %7 {strides = array<i32>} : memref<1x16xf32, #tpu.memory_space<vmem>>, vector<1x16xf32>,
    %c0_i32 = arith.constant 0 : i32
    %8 = arith.cmpi eq, %arg0, %c0_i32 : i32
    %9 = arith.extui %8 : i1 to i32
    %c0_i32_4 = arith.constant 0 : i32
    %10 = arith.cmpi ne, %9, %c0_i32_4 : i32
    scf.if %10 {
      %c0_5 = arith.constant 0 : index
      %c0_6 = arith.constant 0 : index
      %11 = vector.load %arg3[%c0_5, %c0_6] : memref<1x16xf32, #tpu.memory_space<vmem>>, vector<1x16xf32>
      %12 = tpu.iota {dimensions = array<i32: 0>} : vector<1x16xi32>
      %13 = tpu.iota {dimensions = array<i32: 1>} : vector<1x16xi32>
      %c16_i32 = arith.constant 16 : i32
      %14 = vector.broadcast %c16_i32 : i32 to vector<1x16xi32>
      %15 = arith.muli %12, %14 : vector<1x16xi32>
      %16 = arith.addi %15, %13 : vector<1x16xi32>
      %c16_i32_7 = arith.constant 16 : i32
      %17 = vector.broadcast %c16_i32_7 : i32 to vector<1x16xi32>
      %18 = arith.cmpi slt, %16, %17 : vector<1x16xi32>
      %c1_i32 = arith.constant 1 : i32
      %19 = vector.broadcast %c1_i32 : i32 to vector<1x16xi32>
      %20 = arith.andi %13, %19 : vector<1x16xi32>
      %cst_8 = arith.constant 0.000000e+00 : f32
      %21 = vector.broadcast %cst_8 : f32 to vector<1x16xf32>
      %cst_9 = arith.constant 1.000000e+00 : f32
      %22 = vector.broadcast %cst_9 : f32 to vector<1x16xf32>
      %c0_i32_10 = arith.constant 0 : i32
      %23 = vector.broadcast %c0_i32_10 : i32 to vector<1x16xi32>
      %24 = arith.cmpi eq, %20, %23 : vector<1x16xi32>
      %25 = arith.andi %24, %18 : vector<1x16xi1>
      %cst_11 = arith.constant 0xFF800000 : f32
      %26 = vector.broadcast %cst_11 : f32 to vector<1x16xf32>
      %27 = arith.select %25, %11, %26 : vector<1x16xi1>, vector<1x16xf32>
      %28 = vector.shape_cast %27 : vector<1x16xf32> to vector<1x1x16xf32>
      %cst_12 = arith.constant dense<0xFF800000> : vector<1xf32>
      %29 = vector.multi_reduction <maximumf>, %28, %cst_12 [1, 2] : vector<1x1x16xf32> to vector<1xf32>
      %30 = vector.shape_cast %29 : vector<1xf32> to vector<1x1x1xf32>
      %31 = vector.extract %30[0, 0, 0] : f32 from vector<1x1x1xf32>
      %32 = vector.broadcast %31 : f32 to vector<1x16xf32>
      %33 = arith.select %25, %11, %32 : vector<1x16xi1>, vector<1x16xf32>
      %34 = vector.broadcast %31 : f32 to vector<1x16xf32>
      %35 = arith.subf %33, %34 : vector<1x16xf32>
      %36 = math.exp %35 : vector<1x16xf32>
      %cst_13 = arith.constant 0.000000e+00 : f32
      %37 = vector.broadcast %cst_13 : f32 to vector<1x16xf32>
      %38 = arith.select %25, %36, %37 : vector<1x16xi1>, vector<1x16xf32>
      %39 = vector.shape_cast %38 : vector<1x16xf32> to vector<1x1x16xf32>
      %cst_14 = arith.constant dense<0.000000e+00> : vector<1xf32>
      %40 = vector.multi_reduction <add>, %39, %cst_14 [1, 2] : vector<1x1x16xf32> to vector<1xf32>
      %41 = vector.shape_cast %40 : vector<1xf32> to vector<1x1x1xf32>
      %42 = vector.extract %41[0, 0, 0] : f32 from vector<1x1x1xf32>
      %c0_i32_15 = arith.constant 0 : i32
      %43 = vector.broadcast %c0_i32_15 : i32 to vector<1x16xi32>
      %44 = arith.cmpi eq, %20, %43 : vector<1x16xi32>
      %45 = vector.broadcast %31 : f32 to vector<1x16xf32>
      %46 = arith.select %44, %45, %21 : vector<1x16xi1>, vector<1x16xf32>
      %47 = vector.broadcast %42 : f32 to vector<1x16xf32>
      %48 = arith.select %44, %47, %22 : vector<1x16xi1>, vector<1x16xf32>
      %c1_i32_16 = arith.constant 1 : i32
      %49 = vector.broadcast %c1_i32_16 : i32 to vector<1x16xi32>
      %50 = arith.cmpi eq, %20, %49 : vector<1x16xi32>
      %51 = arith.andi %50, %18 : vector<1x16xi1>
      %cst_17 = arith.constant 0xFF800000 : f32
      %52 = vector.broadcast %cst_17 : f32 to vector<1x16xf32>
      %53 = arith.select %51, %11, %52 : vector<1x16xi1>, vector<1x16xf32>
      %54 = vector.shape_cast %53 : vector<1x16xf32> to vector<1x1x16xf32>
      %cst_18 = arith.constant dense<0xFF800000> : vector<1xf32>
      %55 = vector.multi_reduction <maximumf>, %54, %cst_18 [1, 2] : vector<1x1x16xf32> to vector<1xf32>
      %56 = vector.shape_cast %55 : vector<1xf32> to vector<1x1x1xf32>
      %57 = vector.extract %56[0, 0, 0] : f32 from vector<1x1x1xf32>
      %58 = vector.broadcast %57 : f32 to vector<1x16xf32>
      %59 = arith.select %51, %11, %58 : vector<1x16xi1>, vector<1x16xf32>
      %60 = vector.broadcast %57 : f32 to vector<1x16xf32>
      %61 = arith.subf %59, %60 : vector<1x16xf32>
      %62 = math.exp %61 : vector<1x16xf32>
      %cst_19 = arith.constant 0.000000e+00 : f32
      %63 = vector.broadcast %cst_19 : f32 to vector<1x16xf32>
      %64 = arith.select %51, %62, %63 : vector<1x16xi1>, vector<1x16xf32>
      %65 = vector.shape_cast %64 : vector<1x16xf32> to vector<1x1x16xf32>
      %cst_20 = arith.constant dense<0.000000e+00> : vector<1xf32>
      %66 = vector.multi_reduction <add>, %65, %cst_20 [1, 2] : vector<1x1x16xf32> to vector<1xf32>
      %67 = vector.shape_cast %66 : vector<1xf32> to vector<1x1x1xf32>
      %68 = vector.extract %67[0, 0, 0] : f32 from vector<1x1x1xf32>
      %c1_i32_21 = arith.constant 1 : i32
      %69 = vector.broadcast %c1_i32_21 : i32 to vector<1x16xi32>
      %70 = arith.cmpi eq, %20, %69 : vector<1x16xi32>
      %71 = vector.broadcast %57 : f32 to vector<1x16xf32>
      %72 = arith.select %70, %71, %46 : vector<1x16xi1>, vector<1x16xf32>
      %73 = vector.broadcast %68 : f32 to vector<1x16xf32>
      %74 = arith.select %70, %73, %48 : vector<1x16xi1>, vector<1x16xf32>
      %75 = arith.select %18, %11, %72 : vector<1x16xi1>, vector<1x16xf32>
      %76 = arith.subf %75, %72 : vector<1x16xf32>
      %77 = math.exp %76 : vector<1x16xf32>
      %78 = arith.divf %77, %74 : vector<1x16xf32>
      %cst_22 = arith.constant 0.000000e+00 : f32
      %79 = vector.broadcast %cst_22 : f32 to vector<1x16xf32>
      %80 = arith.select %18, %78, %79 : vector<1x16xi1>, vector<1x16xf32>
      %c0_23 = arith.constant 0 : index
      %c0_24 = arith.constant 0 : index
      %81 = vector.load %arg3[%c0_23, %c0_24] : memref<1x16xf32, #tpu.memory_space<vmem>>, vector<1x16xf32>
      tpu.vector_store %arg3[%c0_23, %c0_24], %80 {strides = array<i32>} : memref<1x16xf32, #tpu.memory_space<vmem>>, vector<1x16xf32>,
    } else {
    }
    return
  }
  func.func @transform_0(%arg0: i32) -> (i32, i32) {
    %c0_i32 = arith.constant 0 : i32
    %c0_i32_0 = arith.constant 0 : i32
    return %arg0, %c0_i32 : i32, i32
  }
  func.func @transform_1(%arg0: i32) -> (i32, i32) {
    %c0_i32 = arith.constant 0 : i32
    %c0_i32_0 = arith.constant 0 : i32
    %c0_i32_1 = arith.constant 0 : i32
    return %c0_i32, %c0_i32_0 : i32, i32
  }
  func.func @transform_2(%arg0: i32) -> (i32, i32) {
    %c0_i32 = arith.constant 0 : i32
    %c0_i32_0 = arith.constant 0 : i32
    %c0_i32_1 = arith.constant 0 : i32
    return %c0_i32, %c0_i32_0 : i32, i32
  }
}

</mosaic_0001>

<bundles_post_ra>
// kernel: attention_dot.1
= control target key start
LH: loop header
LB: loop body
LE: loop exit
PB: predicated region body
PF: predicated region fallthrough
CT: control target
= control target key end

     0   :  { %vm17_vm0 = vcmask 261120   ;;  %v26_v8 = vlaneseq  ;;  %vm37_vm1 = vcmask 130112   ;;  %vm40_vm2 = vcmask 122880   ;;  %s245_s0 = inlined_call_operand.vmem [shape: f32[16,32], index: 0, kind: input, shape index: {}]   ;;  %s246_s1 = inlined_call_operand.vmem [shape: f32[16,32], index: 1, kind: input, shape index: {}]   ;;  %s247_s2 = inlined_call_operand.vmem [shape: f32[1,16], index: 2, kind: output, shape index: {}]  }
   0x1   :  { %v11_v0 = vld [vmem:[%s245_s0] sm:$0xff]  ;;  %v12_v2 = vld [vmem:[%s245_s0 + $0x8] sm:$0xff] }
   0x2   :  { %v13_v1 = vld [vmem:[%s246_s1] sm:$0xff]  ;;  %v14_v4 = vld [vmem:[%s246_s1 + $0x8] sm:$0xff]  ;;  %v27_v9 = vand.u32 127, %v26_v8  ;;  %v29_v10 = vshrl.u32 %v26_v8, 7 }
   0x3   :  { %v15_v3 = vmul.f32 %v13_v1, %v11_v0  ;;  %v16_v5 = vmul.f32 %v14_v4, %v12_v2 }
   0x4   :  { %v32_v11 = vadd.s32 4294967288, %v27_v9  ;;  %v30_v13 = vsub.s32 %v27_v9, %v29_v10  ;;  %v49_v15 = vmul.u32 16, %v29_v10  ;;  %v52_v20 = vand.u32 1, %v27_v9 }
   0x5   :  { %v18_v6 = vsel %vm17_vm0, %v15_v3, 0.0  ;;  %v21_v7 = vsel %vm17_vm0, %v16_v5, 0.0 }
   0x6   :  { %19 = vadd.xlane.f32.xlu0 %v18_v6  ;;  %v35_v14 = vsub.s32 %v32_v11, %v29_v10  ;;  %v172_v19 = vadd.s32 %v49_v15, %v27_v9  ;;  %vm179_vm4 = vcmp.eq.s32.totalorder %v52_v20, 1  ;;  %vm183_vm5 = vcmp.eq.s32.totalorder %v52_v20, 0 }
   0x8   :  { %vm51_vm3 = vcmp.lt.s32.totalorder %v172_v19, 16 }
   0x9   :  { %vm191_vm6 = vmand %vm179_vm4, %vm51_vm3 }
   0xa   :  { %22 = vadd.xlane.f32.xlu0 %v21_v7  ;;  %vm199_vm7 = vmand %vm183_vm5, %vm51_vm3 }
  0x93   :  { %v20_v12 = vpop.xlane.xlu0 %19 }
  0x94   :  { %v31_v17 = vrot.slane %v20_v12, %v30_v13 }
  0x97   :  { %v23_v16 = vpop.xlane.xlu0 %22 }
  0x98   :  { %v36_v18 = vrot.slane %v23_v16, %v35_v14 }
  0x9a   :  { %v38_v21 = vsel %vm37_vm1, %v36_v18, %v31_v17 }
  0x9b   :  { %41 = vst.msk [vmem:[%s247_s2] sm:$0x1] %vm40_vm2, %v38_v21 }
  0xa2   :  { %v206_v26 = vld [vmem:[%s247_s2] sm:$0x1] }
  0xa3   :  { %v87_v27 = vsel %vm191_vm6, %v206_v26, -inf  ;;  %v55_v28 = vsel %vm199_vm7, %v206_v26, -inf }
  0xa4   :  { %v88_v29 = vsel %vm40_vm2, %v87_v27, -inf  ;;  %v56_v30 = vsel %vm40_vm2, %v55_v28, -inf }
  0xa5   :  { %89 = vmax.xlane.f32.xlu0 %v88_v29  ;;  %57 = vmax.xlane.f32.xlu1 %v56_v30 }
 0x132   :  { %v58_v31 = vpop.xlane.xlu1 %57  ;;  %v90_v45 = vpop.xlane.xlu0 %89 }
 0x133   :  { %v59_v32 = vrot.slane %v58_v31, 4  ;;  %v91_v46 = vrot.slane %v90_v45, 4 }
 0x135   :  { %v60_v33 = vmax.f32 %v58_v31, %v59_v32  ;;  %v92_v47 = vmax.f32 %v90_v45, %v91_v46 }
 0x137   :  { %v61_v34 = vrot.slane %v60_v33, 2  ;;  %v93_v48 = vrot.slane %v92_v47, 2 }
 0x139   :  { %v62_v35 = vmax.f32 %v60_v33, %v61_v34  ;;  %v94_v52 = vmax.f32 %v92_v47, %v93_v48 }
 0x13b   :  { %v63_v36 = vrot.slane %v62_v35, 1  ;;  %v95_v55 = vrot.slane %v94_v52, 1 }
 0x13d   :  { %v64_v37 = vmax.f32 %v62_v35, %v63_v36  ;;  %v96_v58 = vmax.f32 %v94_v52, %v95_v55 }
 0x13f   :  { %129 = vpush %v64_v37 }
 0x170   :  { %s130_s19 = spop %129 }
 0x171   :  { %v66_v38 = vstv %s130_s19 }
 0x172   :  { %v67_v39 = vsel %vm199_vm7, %v206_v26, %v66_v38  ;;  %v82_v59 = vsel %vm183_vm5, %v66_v38, 0.0 }
 0x173   :  { %v68_v40 = vsub.f32 %v67_v39, %v66_v38 }
 0x175   :  { %v69_v41 = vmul.f32 1.442695, %v68_v40 }
 0x177   :  { %137 = vpow2.f32 %v69_v41 }
 0x181   :  { %v138_v42 = vpop.eup %137 }
 0x182   :  { %v71_v43 = vsel %vm199_vm7, %v138_v42, 0.0 }
 0x183   :  { %v72_v44 = vsel %vm40_vm2, %v71_v43, 0.0 }
 0x184   :  { %73 = vadd.xlane.f32.xlu1 %v72_v44 }
 0x211   :  { %v74_v49 = vpop.xlane.xlu1 %73 }
 0x212   :  { %v75_v50 = vrot.slane %v74_v49, 4 }
 0x214   :  { %v76_v51 = vadd.f32 %v75_v50, %v74_v49 }
 0x216   :  { %v77_v53 = vrot.slane %v76_v51, 2 }
 0x218   :  { %v78_v54 = vadd.f32 %v77_v53, %v76_v51 }
 0x21a   :  { %v79_v56 = vrot.slane %v78_v54, 1 }
 0x21c   :  { %v80_v57 = vadd.f32 %v79_v56, %v78_v54 }
 0x21e   :  { %131 = vpush %v80_v57 }
 0x21f   :  { %133 = vpush %v96_v58 }
 0x24f   :  { %s132_s20 = spop %131 }
 0x250   :  { %s134_s21 = spop %133  ;;  %v83_v13 = vstv %s132_s20 }
 0x251   :  { %v98_v60 = vstv %s134_s21  ;;  %v84_v15 = vsel %vm183_vm5, %v83_v13, 1.0 }
 0x252   :  { %v99_v61 = vsel %vm191_vm6, %v206_v26, %v98_v60  ;;  %v114_v62 = vsel %vm179_vm4, %v98_v60, %v82_v59 }
 0x253   :  { %v100_v63 = vsub.f32 %v99_v61, %v98_v60  ;;  %v117_v11 = vsel %vm51_vm3, %v206_v26, %v114_v62 }
 0x254   :  { %v118_v12 = vsub.f32 %v117_v11, %v114_v62 }
 0x255   :  { %v101_v0 = vmul.f32 1.442695, %v100_v63 }
 0x256   :  { %v119_v14 = vmul.f32 1.442695, %v118_v12 }
 0x257   :  { %139 = vpow2.f32 %v101_v0 }
 0x258   :  { %141 = vpow2.f32 %v119_v14 }
 0x261   :  { %v140_v1 = vpop.eup %139 }
 0x262   :  { %v103_v2 = vsel %vm191_vm6, %v140_v1, 0.0  ;;  %v142_v18 = vpop.eup %141 }
 0x263   :  { %v104_v3 = vsel %vm40_vm2, %v103_v2, 0.0 }
 0x264   :  { %105 = vadd.xlane.f32.xlu1 %v104_v3 }
 0x2f1   :  { %v106_v4 = vpop.xlane.xlu1 %105 }
 0x2f2   :  { %v107_v5 = vrot.slane %v106_v4, 4 }
 0x2f4   :  { %v108_v6 = vadd.f32 %v107_v5, %v106_v4 }
 0x2f6   :  { %v109_v7 = vrot.slane %v108_v6, 2 }
 0x2f8   :  { %v110_v8 = vadd.f32 %v109_v7, %v108_v6 }
 0x2fa   :  { %v111_v9 = vrot.slane %v110_v8, 1 }
 0x2fc   :  { %v112_v10 = vadd.f32 %v111_v9, %v110_v8 }
 0x2fe   :  { %135 = vpush %v112_v10 }
 0x32f   :  { %s136_s22 = spop %135 }
 0x330   :  { %v115_v16 = vstv %s136_s22 }
 0x331   :  { %v116_v17 = vsel %vm179_vm4, %v115_v16, %v84_v15 }
 0x332   :  { %143 = vrcp.f32 %v116_v17 }
 0x33c   :  { %v144_v20 = vpop.eup %143 }
 0x33d   :  { %v122_v21 = vmul.f32 %v144_v20, %v142_v18 }
 0x33f   :  { %v123_v24 = vsel %vm51_vm3, %v122_v21, 0.0 }
 0x340   :  { %124 = vst.msk [vmem:[%s247_s2] sm:$0x1] %vm40_vm2, %v123_v24 }

</bundles_post_ra>
